<compile_context>
chip_gen: v7x
topology: tpu7x:2x2x1
jax: 0.10.0
libtpu: 0.0.40
codegen_flags: <defaults>
</compile_context>

<pallas_src>
import functools

import jax
import jax.numpy as jnp
from jax.experimental import pallas as pl
from jax.experimental.pallas import tpu as pltpu


def _round_up(x: int, m: int) -> int:
    return ((x + m - 1) // m) * m


def _mlp_head_kernel(x_ref, w1_ref, b1_ref, w2_ref, b2_ref, w3_ref, b3_ref, o_ref,
                     *, eps: float, slope: float):
    # Layer 1: cast the f32 x tile to bf16 here (saves a separate wrapper HBM pass).
    x = x_ref[...].astype(jnp.bfloat16)
    h = jnp.dot(x, w1_ref[...], preferred_element_type=jnp.float32)
    h = h + b1_ref[...]
    h = jnp.maximum(h, slope * h)            # LeakyReLU (0 < slope < 1): mul + max

    # Layer 2 (hidden -> hidden).
    h = jnp.dot(h.astype(jnp.bfloat16), w2_ref[...], preferred_element_type=jnp.float32)
    h = h + b2_ref[...]
    h = jnp.maximum(h, slope * h)

    # Layer 3 (hidden -> out).
    y = jnp.dot(h.astype(jnp.bfloat16), w3_ref[...], preferred_element_type=jnp.float32)
    y = y + b3_ref[...]

    # F.normalize(p=2, dim=1, eps): y / max(||y||_2, eps). Lane reduce on the XLU,
    # rsqrt on the EUP (idle slot) instead of a VALU divide.
    ss = jnp.sum(y * y, axis=-1, keepdims=True)
    inv = jnp.where(ss > eps * eps, jax.lax.rsqrt(ss), 1.0 / eps)
    o_ref[...] = (y * inv).astype(o_ref.dtype)


def prepare_mlp_head_params(w1, b1, w2, b2, w3, b3):
    """One-time parameter conversion (hoisted out of the per-forward path):
    bf16 weights for the MXU, f32 row-broadcast biases for the epilogue.
    Weights are expected pre-transposed as (in, out) so the kernel computes x @ W + b."""
    return (w1.astype(jnp.bfloat16),
            b1.reshape(1, -1).astype(jnp.float32),
            w2.astype(jnp.bfloat16),
            b2.reshape(1, -1).astype(jnp.float32),
            w3.astype(jnp.bfloat16),
            b3.reshape(1, -1).astype(jnp.float32))


def mlp_head_forward(x, w1b, b1r, w2b, b2r, w3b, b3r, *,
                     eps: float = 1e-7, negative_slope: float = 0.01, tm: int = 512):
    """Fused MLPHead forward. x: (B, in_dim) f32; params from prepare_mlp_head_params."""
    B, in_dim = x.shape
    hidden = w1b.shape[1]
    out_dim = w3b.shape[1]
    assert w1b.shape == (in_dim, hidden)
    assert w2b.shape == (hidden, hidden)
    assert w3b.shape == (hidden, out_dim)

    # Generation-aware VMEM budget (v5e/v6e: 128 MiB, v7x: 64 MiB per core).
    try:
        vmem_cap = int(pltpu.get_tpu_info().vmem_capacity_bytes)
    except Exception:
        vmem_cap = 64 * 1024 * 1024          # conservative fallback (v7x-sized)
    vmem_budget = int(0.85 * vmem_cap)

    weight_bytes = 2 * (in_dim * hidden + hidden * hidden + hidden * out_dim)  # bf16
    bias_bytes = 4 * (2 * hidden + out_dim)

    def _vmem_est(t, weight_bufs):
        x_bytes = 2 * t * in_dim * 4                 # double-buffered f32 x tiles
        out_bytes = 2 * t * out_dim * 4              # double-buffered f32 out tiles
        live = 4 * t * (3 * hidden + out_dim)        # live f32/bf16 intermediates
        return weight_bufs * weight_bytes + bias_bytes + x_bytes + out_bytes + live

    # Batch tile: multiple of 8 sublanes, no bigger than the (rounded-up) batch, and
    # shrunk until the single-buffered estimate fits the budget.
    tm = min(tm, _round_up(B, 8))
    tm = max(8, _round_up(tm, 8))
    while tm > 8 and _vmem_est(tm, 1) > vmem_budget:
        tm = max(8, _round_up(tm // 2, 8))

    # Keep >=2 grid steps when B permits so ("parallel",) can shard the batch axis
    # across both TensorCores on v7x (each TC has its own VMEM for resident weights).
    if B >= 256 and pl.cdiv(B, tm) < 2:
        tm = _round_up(pl.cdiv(B, 2), 128)

    grid = (pl.cdiv(B, tm),)
    kernel = functools.partial(_mlp_head_kernel, eps=eps, slope=negative_slope)

    def _build(single_buffer_weights: bool):
        res_kw = {}
        weight_bufs = 2
        if single_buffer_weights and hasattr(pl, "Buffered"):
            res_kw = dict(pipeline_mode=pl.Buffered(1))   # constant index_map -> 1 buffer
            weight_bufs = 1
        vmem_limit = int(min(max(_vmem_est(tm, weight_bufs) * 1.5, 32 << 20), vmem_budget))
        in_specs = [
            pl.BlockSpec((tm, in_dim), lambda i: (i, 0)),             # x tile (batch-tiled)
            pl.BlockSpec((in_dim, hidden), lambda i: (0, 0), **res_kw),   # W1 resident
            pl.BlockSpec((1, hidden), lambda i: (0, 0), **res_kw),        # b1 resident
            pl.BlockSpec((hidden, hidden), lambda i: (0, 0), **res_kw),   # W2 resident
            pl.BlockSpec((1, hidden), lambda i: (0, 0), **res_kw),        # b2 resident
            pl.BlockSpec((hidden, out_dim), lambda i: (0, 0), **res_kw),  # W3 resident
            pl.BlockSpec((1, out_dim), lambda i: (0, 0), **res_kw),       # b3 resident
        ]
        return pl.pallas_call(
            kernel,
            out_shape=jax.ShapeDtypeStruct((B, out_dim), jnp.float32),
            grid_spec=pltpu.PrefetchScalarGridSpec(
                num_scalar_prefetch=0,
                grid=grid,
                in_specs=in_specs,
                out_specs=pl.BlockSpec((tm, out_dim), lambda i: (i, 0)),
            ),
            compiler_params=pltpu.CompilerParams(
                dimension_semantics=("parallel",),
                vmem_limit_bytes=vmem_limit,
            ),
        )

    try:
        return _build(True)(x, w1b, b1r, w2b, b2r, w3b, b3r)
    except Exception:
        # Fallback if Buffered(1) is unsupported in this JAX build; costs extra VMEM only.
        return _build(False)(x, w1b, b1r, w2b, b2r, w3b, b3r)


def _reference_forward(x, w1, b1, w2, b2, w3, b3, eps=1e-7, slope=0.01):
    h = x @ w1 + b1
    h = jnp.where(h > 0, h, slope * h)
    h = h @ w2 + b2
    h = jnp.where(h > 0, h, slope * h)
    y = h @ w3 + b3
    n = jnp.sqrt(jnp.sum(y * y, axis=1, keepdims=True))
    return y / jnp.maximum(n, eps)


if __name__ == "__main__":
    # Small shapes consistent with the module (Linear -> LeakyReLU x2 -> Linear -> normalize).
    B, IN, HID, OUT = 16, 128, 256, 128
    key = jax.random.PRNGKey(0)
    kx, k1, k2, k3, kb1, kb2, kb3 = jax.random.split(key, 7)

    x = jax.random.normal(kx, (B, IN), dtype=jnp.float32)
    # trunc_normal(std=0.02)-style init approximated with normal*0.02; small nonzero
    # biases so the bias path is exercised.
    w1 = 0.02 * jax.random.normal(k1, (IN, HID), dtype=jnp.float32)
    w2 = 0.02 * jax.random.normal(k2, (HID, HID), dtype=jnp.float32)
    w3 = 0.02 * jax.random.normal(k3, (HID, OUT), dtype=jnp.float32)
    b1 = 0.01 * jax.random.normal(kb1, (HID,), dtype=jnp.float32)
    b2 = 0.01 * jax.random.normal(kb2, (HID,), dtype=jnp.float32)
    b3 = 0.01 * jax.random.normal(kb3, (OUT,), dtype=jnp.float32)

    params = prepare_mlp_head_params(w1, b1, w2, b2, w3, b3)   # one-time bf16/f32 prep
    y = mlp_head_forward(x, *params)
    y = jax.block_until_ready(y)

    assert y.shape == (B, OUT), y.shape
    assert bool(jnp.all(jnp.isfinite(y))), "non-finite output"

    # Semantic check: rows are unit-norm after F.normalize.
    row_norms = jnp.sqrt(jnp.sum(y * y, axis=1))
    assert bool(jnp.all(jnp.abs(row_norms - 1.0) < 1e-2)), "rows not L2-normalized"

    # Loose numeric check vs f32 JAX reference (kernel uses bf16 MXU inputs).
    y_ref = _reference_forward(x, w1, b1, w2, b2, w3, b3)
    assert bool(jnp.allclose(y, y_ref, atol=5e-2, rtol=5e-2)), "mismatch vs reference"

    print("KERNEL_OK")
</pallas_src>

<mosaic_0001>
module attributes {stable_mosaic.version = 11 : i64} {
  func.func @_mlp_head_kernel(%arg0: i32, %arg1: memref<16x128xf32, #tpu.memory_space<vmem>>, %arg2: memref<128x256xbf16, #tpu.memory_space<vmem>>, %arg3: memref<1x256xf32, #tpu.memory_space<vmem>>, %arg4: memref<256x256xbf16, #tpu.memory_space<vmem>>, %arg5: memref<1x256xf32, #tpu.memory_space<vmem>>, %arg6: memref<256x128xbf16, #tpu.memory_space<vmem>>, %arg7: memref<1x128xf32, #tpu.memory_space<vmem>>, %arg8: memref<16x128xf32, #tpu.memory_space<vmem>>) attributes {dimension_semantics = [#tpu.dimension_semantics<parallel>], iteration_bounds = array<i64: 1>, scalar_prefetch = 0 : i64, scratch_operands = 0 : i64, tpu.core_type = #tpu.core_type<tc>, window_params = [{transform_indices = @transform_0, window_bounds = array<i64: 16, 128>}, {pipeline_mode = #tpu.pipeline_mode<synchronous>, transform_indices = @transform_1, window_bounds = array<i64: 128, 256>}, {pipeline_mode = #tpu.pipeline_mode<synchronous>, transform_indices = @transform_2, window_bounds = array<i64: 1, 256>}, {pipeline_mode = #tpu.pipeline_mode<synchronous>, transform_indices = @transform_3, window_bounds = array<i64: 256, 256>}, {pipeline_mode = #tpu.pipeline_mode<synchronous>, transform_indices = @transform_4, window_bounds = array<i64: 1, 256>}, {pipeline_mode = #tpu.pipeline_mode<synchronous>, transform_indices = @transform_5, window_bounds = array<i64: 256, 128>}, {pipeline_mode = #tpu.pipeline_mode<synchronous>, transform_indices = @transform_6, window_bounds = array<i64: 1, 128>}, {transform_indices = @transform_7, window_bounds = array<i64: 16, 128>}]} {
    %c0 = arith.constant 0 : index
    %c0_0 = arith.constant 0 : index
    %0 = vector.load %arg1[%c0, %c0_0] : memref<16x128xf32, #tpu.memory_space<vmem>>, vector<16x128xf32>
    %1 = arith.truncf %0 : vector<16x128xf32> to vector<16x128xbf16>
    %c0_1 = arith.constant 0 : index
    %c0_2 = arith.constant 0 : index
    %2 = vector.load %arg2[%c0_1, %c0_2] : memref<128x256xbf16, #tpu.memory_space<vmem>>, vector<128x256xbf16>
    %cst = arith.constant dense<0.000000e+00> : vector<16x256xf32>
    %3 = tpu.matmul %1, %2, %cst {dimension_numbers = #tpu.dot_dimension_numbers<[1], [0], [0], [1], [0, 0, 1, 1], [], []>} : vector<16x128xbf16>, vector<128x256xbf16>, vector<16x256xf32> -> vector<16x256xf32>
    %c0_3 = arith.constant 0 : index
    %c0_4 = arith.constant 0 : index
    %4 = vector.load %arg3[%c0_3, %c0_4] : memref<1x256xf32, #tpu.memory_space<vmem>>, vector<1x256xf32>
    %5 = vector.broadcast %4 : vector<1x256xf32> to vector<16x256xf32>
    %6 = arith.addf %3, %5 : vector<16x256xf32>
    %cst_5 = arith.constant 0.00999999977 : f32
    %7 = vector.broadcast %cst_5 : f32 to vector<16x256xf32>
    %8 = arith.mulf %7, %6 : vector<16x256xf32>
    %9 = arith.maximumf %6, %8 : vector<16x256xf32>
    %10 = arith.truncf %9 : vector<16x256xf32> to vector<16x256xbf16>
    %c0_6 = arith.constant 0 : index
    %c0_7 = arith.constant 0 : index
    %11 = vector.load %arg4[%c0_6, %c0_7] : memref<256x256xbf16, #tpu.memory_space<vmem>>, vector<256x256xbf16>
    %cst_8 = arith.constant dense<0.000000e+00> : vector<16x256xf32>
    %12 = tpu.matmul %10, %11, %cst_8 {dimension_numbers = #tpu.dot_dimension_numbers<[1], [0], [0], [1], [0, 0, 1, 1], [], []>} : vector<16x256xbf16>, vector<256x256xbf16>, vector<16x256xf32> -> vector<16x256xf32>
    %c0_9 = arith.constant 0 : index
    %c0_10 = arith.constant 0 : index
    %13 = vector.load %arg5[%c0_9, %c0_10] : memref<1x256xf32, #tpu.memory_space<vmem>>, vector<1x256xf32>
    %14 = vector.broadcast %13 : vector<1x256xf32> to vector<16x256xf32>
    %15 = arith.addf %12, %14 : vector<16x256xf32>
    %cst_11 = arith.constant 0.00999999977 : f32
    %16 = vector.broadcast %cst_11 : f32 to vector<16x256xf32>
    %17 = arith.mulf %16, %15 : vector<16x256xf32>
    %18 = arith.maximumf %15, %17 : vector<16x256xf32>
    %19 = arith.truncf %18 : vector<16x256xf32> to vector<16x256xbf16>
    %c0_12 = arith.constant 0 : index
    %c0_13 = arith.constant 0 : index
    %20 = vector.load %arg6[%c0_12, %c0_13] : memref<256x128xbf16, #tpu.memory_space<vmem>>, vector<256x128xbf16>
    %cst_14 = arith.constant dense<0.000000e+00> : vector<16x128xf32>
    %21 = tpu.matmul %19, %20, %cst_14 {dimension_numbers = #tpu.dot_dimension_numbers<[1], [0], [0], [1], [0, 0, 1, 1], [], []>} : vector<16x256xbf16>, vector<256x128xbf16>, vector<16x128xf32> -> vector<16x128xf32>
    %c0_15 = arith.constant 0 : index
    %c0_16 = arith.constant 0 : index
    %22 = vector.load %arg7[%c0_15, %c0_16] : memref<1x128xf32, #tpu.memory_space<vmem>>, vector<1x128xf32>
    %23 = vector.broadcast %22 : vector<1x128xf32> to vector<16x128xf32>
    %24 = arith.addf %21, %23 : vector<16x128xf32>
    %25 = arith.mulf %24, %24 : vector<16x128xf32>
    %cst_17 = arith.constant dense<0.000000e+00> : vector<16xf32>
    %26 = vector.multi_reduction <add>, %25, %cst_17 [1] : vector<16x128xf32> to vector<16xf32>
    %27 = vector.shape_cast %26 : vector<16xf32> to vector<16x1xf32>
    %cst_18 = arith.constant 9.99999982E-15 : f32
    %28 = vector.broadcast %cst_18 : f32 to vector<16x1xf32>
    %29 = arith.cmpf ogt, %27, %28 : vector<16x1xf32>
    %30 = math.rsqrt %27 : vector<16x1xf32>
    %cst_19 = arith.constant 1.000000e+07 : f32
    %31 = vector.broadcast %cst_19 : f32 to vector<16x1xf32>
    %32 = arith.select %29, %30, %31 : vector<16x1xi1>, vector<16x1xf32>
    %33 = vector.broadcast %32 : vector<16x1xf32> to vector<16x128xf32>
    %34 = arith.mulf %24, %33 : vector<16x128xf32>
    %c0_20 = arith.constant 0 : index
    %c0_21 = arith.constant 0 : index
    %35 = vector.load %arg8[%c0_20, %c0_21] : memref<16x128xf32, #tpu.memory_space<vmem>>, vector<16x128xf32>
    tpu.vector_store %arg8[%c0_20, %c0_21], %34 {strides = array<i32>} : memref<16x128xf32, #tpu.memory_space<vmem>>, vector<16x128xf32>,
    return
  }
  func.func @transform_0(%arg0: i32) -> (i32, i32) {
    %c0_i32 = arith.constant 0 : i32
    %c0_i32_0 = arith.constant 0 : i32
    return %arg0, %c0_i32 : i32, i32
  }
  func.func @transform_1(%arg0: i32) -> (i32, i32) {
    %c0_i32 = arith.constant 0 : i32
    %c0_i32_0 = arith.constant 0 : i32
    %c0_i32_1 = arith.constant 0 : i32
    return %c0_i32, %c0_i32_0 : i32, i32
  }
  func.func @transform_2(%arg0: i32) -> (i32, i32) {
    %c0_i32 = arith.constant 0 : i32
    %c0_i32_0 = arith.constant 0 : i32
    %c0_i32_1 = arith.constant 0 : i32
    return %c0_i32, %c0_i32_0 : i32, i32
  }
  func.func @transform_3(%arg0: i32) -> (i32, i32) {
    %c0_i32 = arith.constant 0 : i32
    %c0_i32_0 = arith.constant 0 : i32
    %c0_i32_1 = arith.constant 0 : i32
    return %c0_i32, %c0_i32_0 : i32, i32
  }
  func.func @transform_4(%arg0: i32) -> (i32, i32) {
    %c0_i32 = arith.constant 0 : i32
    %c0_i32_0 = arith.constant 0 : i32
    %c0_i32_1 = arith.constant 0 : i32
    return %c0_i32, %c0_i32_0 : i32, i32
  }
  func.func @transform_5(%arg0: i32) -> (i32, i32) {
    %c0_i32 = arith.constant 0 : i32
    %c0_i32_0 = arith.constant 0 : i32
    %c0_i32_1 = arith.constant 0 : i32
    return %c0_i32, %c0_i32_0 : i32, i32
  }
  func.func @transform_6(%arg0: i32) -> (i32, i32) {
    %c0_i32 = arith.constant 0 : i32
    %c0_i32_0 = arith.constant 0 : i32
    %c0_i32_1 = arith.constant 0 : i32
    return %c0_i32, %c0_i32_0 : i32, i32
  }
  func.func @transform_7(%arg0: i32) -> (i32, i32) {
    %c0_i32 = arith.constant 0 : i32
    %c0_i32_0 = arith.constant 0 : i32
    return %arg0, %c0_i32 : i32, i32
  }
}

module attributes {stable_mosaic.version = 11 : i64} {
  func.func @_mlp_head_kernel(%arg0: i32, %arg1: memref<16x128xf32, #tpu.memory_space<vmem>>, %arg2: memref<128x256xbf16, #tpu.memory_space<vmem>>, %arg3: memref<1x256xf32, #tpu.memory_space<vmem>>, %arg4: memref<256x256xbf16, #tpu.memory_space<vmem>>, %arg5: memref<1x256xf32, #tpu.memory_space<vmem>>, %arg6: memref<256x128xbf16, #tpu.memory_space<vmem>>, %arg7: memref<1x128xf32, #tpu.memory_space<vmem>>, %arg8: memref<16x128xf32, #tpu.memory_space<vmem>>) attributes {dimension_semantics = [#tpu.dimension_semantics<parallel>], iteration_bounds = array<i64: 1>, scalar_prefetch = 0 : i64, scratch_operands = 0 : i64, tpu.core_type = #tpu.core_type<tc>, window_params = [{transform_indices = @transform_0, window_bounds = array<i64: 16, 128>}, {pipeline_mode = #tpu.pipeline_mode<synchronous>, transform_indices = @transform_1, window_bounds = array<i64: 128, 256>}, {pipeline_mode = #tpu.pipeline_mode<synchronous>, transform_indices = @transform_2, window_bounds = array<i64: 1, 256>}, {pipeline_mode = #tpu.pipeline_mode<synchronous>, transform_indices = @transform_3, window_bounds = array<i64: 256, 256>}, {pipeline_mode = #tpu.pipeline_mode<synchronous>, transform_indices = @transform_4, window_bounds = array<i64: 1, 256>}, {pipeline_mode = #tpu.pipeline_mode<synchronous>, transform_indices = @transform_5, window_bounds = array<i64: 256, 128>}, {pipeline_mode = #tpu.pipeline_mode<synchronous>, transform_indices = @transform_6, window_bounds = array<i64: 1, 128>}, {transform_indices = @transform_7, window_bounds = array<i64: 16, 128>}]} {
    %c0 = arith.constant 0 : index
    %c0_0 = arith.constant 0 : index
    %0 = vector.load %arg1[%c0, %c0_0] : memref<16x128xf32, #tpu.memory_space<vmem>>, vector<16x128xf32>
    %1 = arith.truncf %0 : vector<16x128xf32> to vector<16x128xbf16>
    %c0_1 = arith.constant 0 : index
    %c0_2 = arith.constant 0 : index
    %2 = vector.load %arg2[%c0_1, %c0_2] : memref<128x256xbf16, #tpu.memory_space<vmem>>, vector<128x256xbf16>
    %cst = arith.constant dense<0.000000e+00> : vector<16x256xf32>
    %3 = tpu.matmul %1, %2, %cst {dimension_numbers = #tpu.dot_dimension_numbers<[1], [0], [0], [1], [0, 0, 1, 1], [], []>} : vector<16x128xbf16>, vector<128x256xbf16>, vector<16x256xf32> -> vector<16x256xf32>
    %c0_3 = arith.constant 0 : index
    %c0_4 = arith.constant 0 : index
    %4 = vector.load %arg3[%c0_3, %c0_4] : memref<1x256xf32, #tpu.memory_space<vmem>>, vector<1x256xf32>
    %5 = vector.broadcast %4 : vector<1x256xf32> to vector<16x256xf32>
    %6 = arith.addf %3, %5 : vector<16x256xf32>
    %cst_5 = arith.constant 0.00999999977 : f32
    %7 = vector.broadcast %cst_5 : f32 to vector<16x256xf32>
    %8 = arith.mulf %7, %6 : vector<16x256xf32>
    %9 = arith.maximumf %6, %8 : vector<16x256xf32>
    %10 = arith.truncf %9 : vector<16x256xf32> to vector<16x256xbf16>
    %c0_6 = arith.constant 0 : index
    %c0_7 = arith.constant 0 : index
    %11 = vector.load %arg4[%c0_6, %c0_7] : memref<256x256xbf16, #tpu.memory_space<vmem>>, vector<256x256xbf16>
    %cst_8 = arith.constant dense<0.000000e+00> : vector<16x256xf32>
    %12 = tpu.matmul %10, %11, %cst_8 {dimension_numbers = #tpu.dot_dimension_numbers<[1], [0], [0], [1], [0, 0, 1, 1], [], []>} : vector<16x256xbf16>, vector<256x256xbf16>, vector<16x256xf32> -> vector<16x256xf32>
    %c0_9 = arith.constant 0 : index
    %c0_10 = arith.constant 0 : index
    %13 = vector.load %arg5[%c0_9, %c0_10] : memref<1x256xf32, #tpu.memory_space<vmem>>, vector<1x256xf32>
    %14 = vector.broadcast %13 : vector<1x256xf32> to vector<16x256xf32>
    %15 = arith.addf %12, %14 : vector<16x256xf32>
    %cst_11 = arith.constant 0.00999999977 : f32
    %16 = vector.broadcast %cst_11 : f32 to vector<16x256xf32>
    %17 = arith.mulf %16, %15 : vector<16x256xf32>
    %18 = arith.maximumf %15, %17 : vector<16x256xf32>
    %19 = arith.truncf %18 : vector<16x256xf32> to vector<16x256xbf16>
    %c0_12 = arith.constant 0 : index
    %c0_13 = arith.constant 0 : index
    %20 = vector.load %arg6[%c0_12, %c0_13] : memref<256x128xbf16, #tpu.memory_space<vmem>>, vector<256x128xbf16>
    %cst_14 = arith.constant dense<0.000000e+00> : vector<16x128xf32>
    %21 = tpu.matmul %19, %20, %cst_14 {dimension_numbers = #tpu.dot_dimension_numbers<[1], [0], [0], [1], [0, 0, 1, 1], [], []>} : vector<16x256xbf16>, vector<256x128xbf16>, vector<16x128xf32> -> vector<16x128xf32>
    %c0_15 = arith.constant 0 : index
    %c0_16 = arith.constant 0 : index
    %22 = vector.load %arg7[%c0_15, %c0_16] : memref<1x128xf32, #tpu.memory_space<vmem>>, vector<1x128xf32>
    %23 = vector.broadcast %22 : vector<1x128xf32> to vector<16x128xf32>
    %24 = arith.addf %21, %23 : vector<16x128xf32>
    %25 = arith.mulf %24, %24 : vector<16x128xf32>
    %cst_17 = arith.constant dense<0.000000e+00> : vector<16xf32>
    %26 = vector.multi_reduction <add>, %25, %cst_17 [1] : vector<16x128xf32> to vector<16xf32>
    %27 = vector.shape_cast %26 : vector<16xf32> to vector<16x1xf32>
    %cst_18 = arith.constant 9.99999982E-15 : f32
    %28 = vector.broadcast %cst_18 : f32 to vector<16x1xf32>
    %29 = arith.cmpf ogt, %27, %28 : vector<16x1xf32>
    %30 = math.rsqrt %27 : vector<16x1xf32>
    %cst_19 = arith.constant 1.000000e+07 : f32
    %31 = vector.broadcast %cst_19 : f32 to vector<16x1xf32>
    %32 = arith.select %29, %30, %31 : vector<16x1xi1>, vector<16x1xf32>
    %33 = vector.broadcast %32 : vector<16x1xf32> to vector<16x128xf32>
    %34 = arith.mulf %24, %33 : vector<16x128xf32>
    %c0_20 = arith.constant 0 : index
    %c0_21 = arith.constant 0 : index
    %35 = vector.load %arg8[%c0_20, %c0_21] : memref<16x128xf32, #tpu.memory_space<vmem>>, vector<16x128xf32>
    tpu.vector_store %arg8[%c0_20, %c0_21], %34 {strides = array<i32>} : memref<16x128xf32, #tpu.memory_space<vmem>>, vector<16x128xf32>,
    return
  }
  func.func @transform_0(%arg0: i32) -> (i32, i32) {
    %c0_i32 = arith.constant 0 : i32
    %c0_i32_0 = arith.constant 0 : i32
    return %arg0, %c0_i32 : i32, i32
  }
  func.func @transform_1(%arg0: i32) -> (i32, i32) {
    %c0_i32 = arith.constant 0 : i32
    %c0_i32_0 = arith.constant 0 : i32
    %c0_i32_1 = arith.constant 0 : i32
    return %c0_i32, %c0_i32_0 : i32, i32
  }
  func.func @transform_2(%arg0: i32) -> (i32, i32) {
    %c0_i32 = arith.constant 0 : i32
    %c0_i32_0 = arith.constant 0 : i32
    %c0_i32_1 = arith.constant 0 : i32
    return %c0_i32, %c0_i32_0 : i32, i32
  }
  func.func @transform_3(%arg0: i32) -> (i32, i32) {
    %c0_i32 = arith.constant 0 : i32
    %c0_i32_0 = arith.constant 0 : i32
    %c0_i32_1 = arith.constant 0 : i32
    return %c0_i32, %c0_i32_0 : i32, i32
  }
  func.func @transform_4(%arg0: i32) -> (i32, i32) {
    %c0_i32 = arith.constant 0 : i32
    %c0_i32_0 = arith.constant 0 : i32
    %c0_i32_1 = arith.constant 0 : i32
    return %c0_i32, %c0_i32_0 : i32, i32
  }
  func.func @transform_5(%arg0: i32) -> (i32, i32) {
    %c0_i32 = arith.constant 0 : i32
    %c0_i32_0 = arith.constant 0 : i32
    %c0_i32_1 = arith.constant 0 : i32
    return %c0_i32, %c0_i32_0 : i32, i32
  }
  func.func @transform_6(%arg0: i32) -> (i32, i32) {
    %c0_i32 = arith.constant 0 : i32
    %c0_i32_0 = arith.constant 0 : i32
    %c0_i32_1 = arith.constant 0 : i32
    return %c0_i32, %c0_i32_0 : i32, i32
  }
  func.func @transform_7(%arg0: i32) -> (i32, i32) {
    %c0_i32 = arith.constant 0 : i32
    %c0_i32_0 = arith.constant 0 : i32
    return %arg0, %c0_i32 : i32, i32
  }
}

</mosaic_0001>

<bundles_post_ra>
// kernel: tpu_custom_call.1
= control target key start
LH: loop header
LB: loop body
LE: loop exit
PB: predicated region body
PF: predicated region fallthrough
CT: control target
= control target key end

     0   :  { %12 = vsyncpa [#allocation3], 0  ;;  %s1167_s0 = inlined_call_operand.hbm [shape: f32[16,128], index: 0, kind: input, shape index: {}]   ;;  %s1168_s1 = inlined_call_operand.hbm [shape: bf16[128,256], index: 1, kind: input, shape index: {}]   ;;  %s1169_s2 = inlined_call_operand.vmem [shape: f32[1,256], index: 2, kind: input, shape index: {}]   ;;  %s1170_s3 = inlined_call_operand.hbm [shape: bf16[256,256], index: 3, kind: input, shape index: {}]   ;;  %s1171_s4 = inlined_call_operand.vmem [shape: f32[1,256], index: 4, kind: input, shape index: {}]   ;;  %s1172_s5 = inlined_call_operand.hbm [shape: bf16[256,128], index: 5, kind: input, shape index: {}]   ;;  %s1173_s6 = inlined_call_operand.vmem [shape: f32[1,128], index: 6, kind: input, shape index: {}]   ;;  %s1174_s7 = inlined_call_operand.hbm [shape: f32[16,128], index: 7, kind: output, shape index: {}]  }
   0x1   :  { %13 = vsyncpa [#allocation6], 0 }
   0x2   :  { %14 = vsyncpa [#allocation9], 0 }
   0x3   :  { %15 = vsyncpa [#allocation4], 0  ;;  %s1022_s24 = smov [#allocation5]   ;;  %s1023_s26 = smov [#allocation2]  }
   0x4   :  { %s33_s25 = sshll.u32 %s1022_s24, 4  ;;  %s21_s27 = sshll.u32 %s1023_s26, 4  ;;  %s34_s25 = int_to_ptr.vmem [resolvable:$true] %s33_s25  ;;  %s1072_s27 = int_to_ptr.vmem [resolvable:$true] %s21_s27 }
   0x5   :  { %s904_s30 = scalar_lea.hbm %s1168_s1, 2048 }
   0x6   :  { %p905_p0 = scmp.ne.s32.totalorder %s1168_s1, %s904_s30  ;;  %p908_p1 = scmp.lt.u32.totalorder %s904_s30, %s1168_s1 }
   0x8   :  { %p910_p2 = pnand %p908_p1, %p905_p0 }
   0xa   :  { %913 = shalt.err (!%p910_p2)
}
   0xb   :  { %s914_s12 = scalar_lea.vmem %s34_s25, 2048  ;;  %p919_p4 = scmp.lt.s32.totalorder %s34_s25, %s34_s25 }
   0xc   :  { %p915_p3 = scmp.ne.s32.totalorder %s34_s25, %s914_s12  ;;  %p920_p5 = scmp.lt.s32.totalorder %s914_s12, %s914_s12 }
   0xe   :  { %p921_p6 = por %p920_p5, %p919_p4 }
  0x10   :  { %p922_p7 = pnand %p921_p6, %p915_p3 }
  0x12   :  { %925 = shalt.err (!%p922_p7)
}
  0x13   :  { %s1024_s13 = smov 128   ;;  %s1025_s14 = smov 8  }
  0x14   :  { %39 = dma.hbm_to_vmem [thread:$0]  %s1168_s1, 2048, %s34_s25, [#allocation6], %s1024_s13, %s1024_s13, %s1025_s14  }
  0x15   :  { %s926_s19 = scalar_lea.hbm %s1167_s0, 256 }
  0x16   :  { %p927_p8 = scmp.ne.s32.totalorder %s1167_s0, %s926_s19  ;;  %p930_p9 = scmp.lt.u32.totalorder %s926_s19, %s1167_s0 }
  0x18   :  { %p932_p10 = pnand %p930_p9, %p927_p8 }
  0x1a   :  { %935 = shalt.err (!%p932_p10)
}
  0x1b   :  { %s936_s24 = scalar_lea.vmem %s1072_s27, 256  ;;  %p941_p12 = scmp.lt.s32.totalorder %s1072_s27, %s1072_s27 }
  0x1c   :  { %p937_p11 = scmp.ne.s32.totalorder %s1072_s27, %s936_s24  ;;  %p942_p13 = scmp.lt.s32.totalorder %s936_s24, %s936_s24 }
  0x1e   :  { %p943_p0 = por %p942_p13, %p941_p12 }
  0x20   :  { %p944_p1 = pnand %p943_p0, %p937_p11 }
  0x22   :  { %947 = shalt.err (!%p944_p1)
}
  0x23   :  { %27 = dma.hbm_to_vmem [thread:$0]  %s1167_s0, 256, %s1072_s27, [#allocation3], %s1024_s13, %s1024_s13, %s1025_s14  }
  0x24   :  { %s1026_s26 = smov [#allocation7]   ;;  %s1027_s29 = smov [#allocation8]  }
  0x25   :  { %s47_s28 = sshll.u32 %s1026_s26, 4  ;;  %s61_s30 = sshll.u32 %s1027_s29, 4  ;;  %s48_s28 = int_to_ptr.vmem [resolvable:$true] %s47_s28  ;;  %s1109_s30 = int_to_ptr.vmem [resolvable:$true] %s61_s30 }
  0x26   :  { %s948_s10 = scalar_lea.hbm %s1170_s3, 4096 }
  0x27   :  { %p949_p2 = scmp.ne.s32.totalorder %s1170_s3, %s948_s10  ;;  %p952_p3 = scmp.lt.u32.totalorder %s948_s10, %s1170_s3 }
  0x29   :  { %p954_p4 = pnand %p952_p3, %p949_p2 }
  0x2b   :  { %957 = shalt.err (!%p954_p4)
}
  0x2c   :  { %s958_s0 = scalar_lea.vmem %s48_s28, 4096  ;;  %p963_p6 = scmp.lt.s32.totalorder %s48_s28, %s48_s28 }
  0x2d   :  { %p959_p5 = scmp.ne.s32.totalorder %s48_s28, %s958_s0  ;;  %p964_p7 = scmp.lt.s32.totalorder %s958_s0, %s958_s0 }
  0x2f   :  { %p965_p8 = por %p964_p7, %p963_p6 }
  0x31   :  { %p966_p9 = pnand %p965_p8, %p959_p5 }
  0x33   :  { %969 = shalt.err (!%p966_p9)
}
  0x34   :  { %53 = dma.hbm_to_vmem [thread:$0]  %s1170_s3, 4096, %s48_s28, [#allocation6], %s1024_s13, %s1024_s13, %s1025_s14  }
  0x35   :  { %s970_s20 = scalar_lea.hbm %s1172_s5, 2048 }
  0x36   :  { %p971_p10 = scmp.ne.s32.totalorder %s1172_s5, %s970_s20  ;;  %p974_p11 = scmp.lt.u32.totalorder %s970_s20, %s1172_s5 }
  0x38   :  { %p976_p12 = pnand %p974_p11, %p971_p10 }
  0x3a   :  { %979 = shalt.err (!%p976_p12)
}
  0x3b   :  { %s980_s1 = scalar_lea.vmem %s1109_s30, 2048  ;;  %p985_p0 = scmp.lt.s32.totalorder %s1109_s30, %s1109_s30 }
  0x3c   :  { %p981_p13 = scmp.ne.s32.totalorder %s1109_s30, %s980_s1  ;;  %p986_p1 = scmp.lt.s32.totalorder %s980_s1, %s980_s1 }
  0x3e   :  { %p987_p2 = por %p986_p1, %p985_p0 }
  0x40   :  { %p988_p3 = pnand %p987_p2, %p981_p13 }
  0x42   :  { %991 = shalt.err (!%p988_p3)
}
  0x43   :  { %s1028_s3 = smov 64   ;;  %s1029_s25 = smov 4  }
  0x44   :  { %67 = dma.hbm_to_vmem [thread:$0]  %s1172_s5, 2048, %s1109_s30, [#allocation9], %s1028_s3, %s1028_s3, %s1029_s25  }
  0x45   :  { %1014 = dma.done.wait [#allocation3], 256  }
  0x46   :  { %1015 = vsyncadd [#allocation3], 4294967040 }
  0x47   :  { %1016 = dma.done.wait [#allocation6], 6144  }
  0x48   :  { %1017 = vsyncadd [#allocation6], 4294961152 }
  0x49   :  { %1018 = dma.done.wait [#allocation9], 2048  }
  0x4a   :  { %1019 = vsyncadd [#allocation9], 4294965248  ;;  %v1030_v0 = vmov 0   ;;  %v812_v1 = vld [vmem:[#allocation5 + $0x4] ss:$8 sps:$4 sm:$0xff]   ;;  %v83_v26 = vld [vmem:[#allocation2] sm:$0xff]  ;;  %v104_v62 = vlaneseq }
  0x4b   :  { %226 = vmatprep.mubr.bf16.mxu0 %v1030_v0  ;;  %v814_v2 = vld [vmem:[#allocation5] ss:$8 sps:$4 sm:$0xff]   ;;  %194 = vmatprep.subr.bf16.mxu0 %v812_v1  ;;  %v815_v3 = vld [vmem:[#allocation5 + $0x14] ss:$8 sps:$4 sm:$0xff]   ;;  %v817_v4 = vld [vmem:[#allocation5 + $0x10] ss:$8 sps:$4 sm:$0xff]  }
  0x4c   :  { %195 = vmatpush1.bf16.msra.mxu0 %v814_v2  ;;  %v818_v5 = vld [vmem:[#allocation5 + $0x24] ss:$8 sps:$4 sm:$0xff]   ;;  %v820_v6 = vld [vmem:[#allocation5 + $0x20] ss:$8 sps:$4 sm:$0xff]   ;;  %v821_v7 = vld [vmem:[#allocation5 + $0x34] ss:$8 sps:$4 sm:$0xff]  }
  0x4d   :  { %196 = vmatprep.subr.bf16.mxu0 %v815_v3  ;;  %v823_v8 = vld [vmem:[#allocation5 + $0x30] ss:$8 sps:$4 sm:$0xff]   ;;  %v824_v9 = vld [vmem:[#allocation5 + $0x44] ss:$8 sps:$4 sm:$0xff]   ;;  %v838_v11 = vld [vmem:[#allocation7] ss:$8 sps:$4 sm:$0xff]  }
  0x4e   :  { %v836_v10 = vld [vmem:[#allocation7 + $0x4] ss:$8 sps:$4 sm:$0xff]   ;;  %v839_v12 = vld [vmem:[#allocation7 + $0x14] ss:$8 sps:$4 sm:$0xff]   ;;  %v826_v13 = vld [vmem:[#allocation5 + $0x40] ss:$8 sps:$4 sm:$0xff]  }
  0x4f   :  { %451 = vmatprep.subr.bf16.mxu1 %v836_v10  ;;  %v841_v14 = vld [vmem:[#allocation7 + $0x10] ss:$8 sps:$4 sm:$0xff]   ;;  %v827_v15 = vld [vmem:[#allocation5 + $0x54] ss:$8 sps:$4 sm:$0xff]   ;;  %v842_v16 = vld [vmem:[#allocation7 + $0x24] ss:$8 sps:$4 sm:$0xff]  }
  0x50   :  { %197 = vmatpush1.bf16.msra.mxu0 %v817_v4  ;;  %452 = vmatpush1.bf16.msra.mxu1 %v838_v11  ;;  %v829_v17 = vld [vmem:[#allocation5 + $0x50] ss:$8 sps:$4 sm:$0xff]   ;;  %v844_v18 = vld [vmem:[#allocation7 + $0x20] ss:$8 sps:$4 sm:$0xff]   ;;  %v830_v19 = vld [vmem:[#allocation5 + $0x64] ss:$8 sps:$4 sm:$0xff]  }
  0x51   :  { %198 = vmatprep.subr.bf16.mxu0 %v818_v5  ;;  %453 = vmatprep.subr.bf16.mxu1 %v839_v12  ;;  %v845_v20 = vld [vmem:[#allocation7 + $0x34] ss:$8 sps:$4 sm:$0xff]   ;;  %v832_v21 = vld [vmem:[#allocation5 + $0x60] ss:$8 sps:$4 sm:$0xff]   ;;  %v847_v22 = vld [vmem:[#allocation7 + $0x30] ss:$8 sps:$4 sm:$0xff]  }
  0x52   :  { %v833_v23 = vld [vmem:[#allocation5 + $0x74] ss:$8 sps:$4 sm:$0xff]   ;;  %v848_v24 = vld [vmem:[#allocation7 + $0x44] ss:$8 sps:$4 sm:$0xff]   ;;  %v835_v25 = vld [vmem:[#allocation5 + $0x70] ss:$8 sps:$4 sm:$0xff]  }
  0x53   :  { %v84_v27 = vld [vmem:[#allocation2 + $0x8] sm:$0xff]  ;;  %v850_v28 = vld [vmem:[#allocation7 + $0x40] ss:$8 sps:$4 sm:$0xff]   ;;  %v854_v32 = vld [vmem:[#allocation7 + $0x64] ss:$8 sps:$4 sm:$0xff]   ;;  %v105_v63 = vshrl.u32 %v104_v62, 7 }
  0x54   :  { %199 = vmatpush1.bf16.msra.mxu0 %v820_v6  ;;  %454 = vmatpush1.bf16.msra.mxu1 %v841_v14  ;;  %v851_v29 = vld [vmem:[#allocation7 + $0x54] ss:$8 sps:$4 sm:$0xff]   ;;  %v853_v30 = vld [vmem:[#allocation7 + $0x50] ss:$8 sps:$4 sm:$0xff]   ;;  %v85_v31 = vpack.c.bf16 %v84_v27, %v83_v26  ;;  %v856_v33 = vld [vmem:[#allocation7 + $0x60] ss:$8 sps:$4 sm:$0xff]  }
  0x55   :  { %200 = vmatprep.subr.bf16.mxu0 %v821_v7  ;;  %455 = vmatprep.subr.bf16.mxu1 %v842_v16  ;;  %v857_v34 = vld [vmem:[#allocation7 + $0x74] ss:$8 sps:$4 sm:$0xff]   ;;  %v859_v35 = vld [vmem:[#allocation7 + $0x70] ss:$8 sps:$4 sm:$0xff]   ;;  %v860_v36 = vld [vmem:[#allocation7 + $0x84] ss:$8 sps:$4 sm:$0xff]  }
  0x56   :  { %v862_v37 = vld [vmem:[#allocation7 + $0x80] ss:$8 sps:$4 sm:$0xff]   ;;  %v863_v38 = vld [vmem:[#allocation7 + $0x94] ss:$8 sps:$4 sm:$0xff]   ;;  %v865_v39 = vld [vmem:[#allocation7 + $0x90] ss:$8 sps:$4 sm:$0xff]  }
  0x57   :  { %v866_v40 = vld [vmem:[#allocation7 + $0xa4] ss:$8 sps:$4 sm:$0xff]   ;;  %v868_v41 = vld [vmem:[#allocation7 + $0xa0] ss:$8 sps:$4 sm:$0xff]   ;;  %v869_v42 = vld [vmem:[#allocation7 + $0xb4] ss:$8 sps:$4 sm:$0xff]  }
  0x58   :  { %201 = vmatpush1.bf16.msra.mxu0 %v823_v8  ;;  %456 = vmatpush1.bf16.msra.mxu1 %v844_v18  ;;  %v871_v43 = vld [vmem:[#allocation7 + $0xb0] ss:$8 sps:$4 sm:$0xff]   ;;  %v872_v44 = vld [vmem:[#allocation7 + $0xc4] ss:$8 sps:$4 sm:$0xff]   ;;  %v874_v45 = vld [vmem:[#allocation7 + $0xc0] ss:$8 sps:$4 sm:$0xff]  }
  0x59   :  { %202 = vmatprep.subr.bf16.mxu0 %v824_v9  ;;  %457 = vmatprep.subr.bf16.mxu1 %v845_v20  ;;  %v875_v46 = vld [vmem:[#allocation7 + $0xd4] ss:$8 sps:$4 sm:$0xff]   ;;  %v877_v47 = vld [vmem:[#allocation7 + $0xd0] ss:$8 sps:$4 sm:$0xff]   ;;  %v878_v48 = vld [vmem:[#allocation7 + $0xe4] ss:$8 sps:$4 sm:$0xff]  }
  0x5a   :  { %v880_v49 = vld [vmem:[#allocation7 + $0xe0] ss:$8 sps:$4 sm:$0xff]   ;;  %v881_v50 = vld [vmem:[#allocation7 + $0xf4] ss:$8 sps:$4 sm:$0xff]   ;;  %v883_v51 = vld [vmem:[#allocation7 + $0xf0] ss:$8 sps:$4 sm:$0xff]  }
  0x5b   :  { %v884_v52 = vld [vmem:[#allocation8 + $0x40] sm:$0xff]   ;;  %v886_v54 = vld [vmem:[#allocation8 + $0x48] sm:$0xff]   ;;  %v888_v56 = vld [vmem:[#allocation8 + $0x50] sm:$0xff]   ;;  %v106_v0 = vsub.s32 0, %v105_v63  ;;  %v110_v2 = vsub.s32 1, %v105_v63  ;;  %s1031_s9 = smov [#allocation10]  }
  0x5c   :  { %203 = vmatpush1.bf16.msra.mxu0 %v826_v13  ;;  %458 = vmatpush1.bf16.msra.mxu1 %v847_v22  ;;  %v885_v53 = vld [vmem:[#allocation8] sm:$0xff]   ;;  %v887_v55 = vld [vmem:[#allocation8 + $0x8] sm:$0xff]   ;;  %v889_v57 = vld [vmem:[#allocation8 + $0x10] sm:$0xff]  }
  0x5d   :  { %204 = vmatprep.subr.bf16.mxu0 %v827_v15  ;;  %459 = vmatprep.subr.bf16.mxu1 %v848_v24  ;;  %v890_v58 = vld [vmem:[#allocation8 + $0x58] sm:$0xff]   ;;  %v892_v60 = vld [vmem:[#allocation8 + $0x60] sm:$0xff]   ;;  %v102_v1 = vld [vmem:[%s1169_s2] sm:$0x3] }
  0x5e   :  { %v891_v59 = vld [vmem:[#allocation8 + $0x18] sm:$0xff]   ;;  %v893_v61 = vld [vmem:[#allocation8 + $0x20] sm:$0xff]   ;;  %v107_v3 = vrot.slane %v102_v1, %v106_v0  ;;  %v111_v4 = vrot.slane %v102_v1, %v110_v2  ;;  %v895_v24 = vld [vmem:[#allocation8 + $0x28] sm:$0xff]  }
  0x5f   :  { %v897_v26 = vld [vmem:[#allocation8 + $0x30] sm:$0xff]   ;;  %v898_v27 = vld [vmem:[#allocation8 + $0x78] sm:$0xff]  }
  0x60   :  { %205 = vmatpush1.bf16.msra.mxu0 %v829_v17  ;;  %460 = vmatpush1.bf16.msra.mxu1 %v850_v28  ;;  %v899_v28 = vld [vmem:[#allocation8 + $0x38] sm:$0xff]  }
  0x61   :  { %206 = vmatprep.subr.bf16.mxu0 %v830_v19  ;;  %461 = vmatprep.subr.bf16.mxu1 %v851_v29  ;;  %v279_v29 = vld [vmem:[%s1171_s4] sm:$0x3] }
  0x64   :  { %207 = vmatpush1.bf16.msra.mxu0 %v832_v21  ;;  %462 = vmatpush1.bf16.msra.mxu1 %v853_v30  ;;  %v284_v30 = vrot.slane %v279_v29, %v106_v0 }
  0x65   :  { %208 = vmatprep.subr.bf16.mxu0 %v833_v23  ;;  %463 = vmatprep.subr.bf16.mxu1 %v854_v32  ;;  %v894_v23 = vld [vmem:[#allocation8 + $0x68] sm:$0xff]  }
  0x68   :  { %209 = vmatpush1.bf16.msra.mxu0 %v835_v25  ;;  %464 = vmatpush1.bf16.msra.mxu1 %v856_v33  ;;  %v896_v25 = vld [vmem:[#allocation8 + $0x70] sm:$0xff]  }
  0x69   :  { %465 = vmatprep.subr.bf16.mxu1 %v857_v34  ;;  %780 = vmatprep.subr.bf16.mxu0 %v884_v52  ;;  %v763_v52 = vld [vmem:[%s1173_s6] ss:$0 sm:$0xff]  ;;  %s701_s6 = sshll.u32 %s1031_s9, 4  ;;  %s702_s6 = int_to_ptr.vmem [resolvable:$true] %s701_s6 }
  0x6a   :  { %s992_s10 = scalar_lea.vmem %s702_s6, 256  ;;  %p997_p5 = scmp.lt.s32.totalorder %s702_s6, %s702_s6 }
  0x6b   :  { %227 = vmatmul.mubr.bf16.vlgmr.msra.gmra.mrb[0].mxu0 %v85_v31  ;;  %v288_v31 = vrot.slane %v279_v29, %v110_v2  ;;  %p993_p4 = scmp.ne.s32.totalorder %s702_s6, %s992_s10  ;;  %p998_p6 = scmp.lt.s32.totalorder %s992_s10, %s992_s10 }
  0x6c   :  { %466 = vmatpush1.bf16.msra.mxu1 %v859_v35  ;;  %781 = vmatpush3.bf16.msra.mxu0 %v885_v53 }
  0x6d   :  { %467 = vmatprep.subr.bf16.mxu1 %v860_v36  ;;  %782 = vmatprep.subr.bf16.mxu0 %v886_v54  ;;  %p999_p7 = por %p998_p6, %p997_p5 }
  0x6f   :  { %p1000_p8 = pnand %p999_p7, %p993_p4 }
  0x70   :  { %468 = vmatpush1.bf16.msra.mxu1 %v862_v37  ;;  %783 = vmatpush3.bf16.msra.mxu0 %v887_v55 }
  0x71   :  { %469 = vmatprep.subr.bf16.mxu1 %v863_v38  ;;  %784 = vmatprep.subr.bf16.mxu0 %v888_v56 }
  0x74   :  { %470 = vmatpush1.bf16.msra.mxu1 %v865_v39  ;;  %785 = vmatpush3.bf16.msra.mxu0 %v889_v57 }
  0x75   :  { %471 = vmatprep.subr.bf16.mxu1 %v866_v40  ;;  %786 = vmatprep.subr.bf16.mxu0 %v890_v58 }
  0x78   :  { %472 = vmatpush1.bf16.msra.mxu1 %v868_v41  ;;  %787 = vmatpush3.bf16.msra.mxu0 %v891_v59 }
  0x79   :  { %473 = vmatprep.subr.bf16.mxu1 %v869_v42  ;;  %788 = vmatprep.subr.bf16.mxu0 %v892_v60 }
  0x7c   :  { %474 = vmatpush1.bf16.msra.mxu1 %v871_v43  ;;  %789 = vmatpush3.bf16.msra.mxu0 %v893_v61 }
  0x7d   :  { %475 = vmatprep.subr.bf16.mxu1 %v872_v44  ;;  %790 = vmatprep.subr.bf16.mxu0 %v894_v23 }
  0x80   :  { %476 = vmatpush1.bf16.msra.mxu1 %v874_v45  ;;  %791 = vmatpush3.bf16.msra.mxu0 %v895_v24 }
  0x81   :  { %477 = vmatprep.subr.bf16.mxu1 %v875_v46  ;;  %792 = vmatprep.subr.bf16.mxu0 %v896_v25 }
  0x84   :  { %478 = vmatpush1.bf16.msra.mxu1 %v877_v47  ;;  %793 = vmatpush3.bf16.msra.mxu0 %v897_v26 }
  0x85   :  { %479 = vmatprep.subr.bf16.mxu1 %v878_v48  ;;  %794 = vmatprep.subr.bf16.mxu0 %v898_v27 }
  0x88   :  { %480 = vmatpush1.bf16.msra.mxu1 %v880_v49  ;;  %795 = vmatpush3.bf16.msra.mxu0 %v899_v28 }
  0x89   :  { %481 = vmatprep.subr.bf16.mxu1 %v881_v50 }
  0x8c   :  { %482 = vmatpush1.bf16.msra.mxu1 %v883_v51 }
 0x13e   :  { %v228_v5 = vpop.f32.mrb[0].mxu0 }
 0x13f   :  { %v229_v6 = vadd.f32 %v228_v5, %v107_v3  ;;  %v230_v7 = vpop.f32.mrb[1].mxu0 }
 0x140   :  { %v231_v8 = vadd.f32 %v230_v7, %v111_v4  ;;  %v232_v9 = vpop.f32.mrb[2].mxu0 }
 0x141   :  { %v237_v10 = vmul.f32 0.01, %v229_v6  ;;  %v233_v11 = vadd.f32 %v232_v9, %v107_v3  ;;  %v234_v12 = vpop.f32.mrb[3].mxu0 }
 0x142   :  { %v238_v13 = vmul.f32 0.01, %v231_v8  ;;  %v235_v14 = vadd.f32 %v234_v12, %v111_v4 }
 0x143   :  { %v239_v15 = vmul.f32 0.01, %v233_v11  ;;  %v241_v17 = vmax.f32 %v229_v6, %v237_v10 }
 0x144   :  { %v240_v16 = vmul.f32 0.01, %v235_v14  ;;  %v242_v19 = vmax.f32 %v231_v8, %v238_v13 }
 0x145   :  { %v243_v18 = vmax.f32 %v233_v11, %v239_v15 }
 0x146   :  { %v244_v20 = vmax.f32 %v235_v14, %v240_v16 }
 0x147   :  { %v245_v21 = vpack.c.bf16 %v243_v18, %v241_v17 }
 0x148   :  { %v246_v22 = vpack.c.bf16 %v244_v20, %v242_v19 }
 0x14a   :  { %483 = vmatprep.mubr.bf16.mxu1 %v246_v22 }
 0x14b   :  { %484 = vmatmul.mubr.bf16.vlgmr.msra.gmra.mrb[0].mxu1 %v245_v21 }
 0x21e   :  { %v485_v32 = vpop.f32.mrb[0].mxu1 }
 0x21f   :  { %v486_v33 = vadd.f32 %v485_v32, %v284_v30  ;;  %v487_v34 = vpop.f32.mrb[1].mxu1 }
 0x220   :  { %v488_v35 = vadd.f32 %v487_v34, %v288_v31  ;;  %v489_v36 = vpop.f32.mrb[2].mxu1 }
 0x221   :  { %v494_v37 = vmul.f32 0.01, %v486_v33  ;;  %v490_v38 = vadd.f32 %v489_v36, %v284_v30  ;;  %v491_v39 = vpop.f32.mrb[3].mxu1 }
 0x222   :  { %v495_v40 = vmul.f32 0.01, %v488_v35  ;;  %v492_v41 = vadd.f32 %v491_v39, %v288_v31 }
 0x223   :  { %v496_v42 = vmul.f32 0.01, %v490_v38  ;;  %v498_v44 = vmax.f32 %v486_v33, %v494_v37 }
 0x224   :  { %v497_v43 = vmul.f32 0.01, %v492_v41  ;;  %v499_v46 = vmax.f32 %v488_v35, %v495_v40 }
 0x225   :  { %v500_v45 = vmax.f32 %v490_v38, %v496_v42 }
 0x226   :  { %v501_v47 = vmax.f32 %v492_v41, %v497_v43 }
 0x227   :  { %v502_v48 = vpack.c.bf16 %v500_v45, %v498_v44 }
 0x228   :  { %v503_v49 = vpack.c.bf16 %v501_v47, %v499_v46 }
 0x22a   :  { %671 = vmatprep.mubr.bf16.mxu0 %v503_v49 }
 0x22b   :  { %672 = vmatmul.mubr.bf16.vlgmr.msra.gmra.mrb[4].mxu0 %v502_v48 }
 0x2fe   :  { %v796_v50 = vpop.f32.mrb[4].mxu0 }
 0x2ff   :  { %v797_v51 = vpop.f32.mrb[5].mxu0 }
 0x300   :  { %v798_v53 = vadd.f32 %v797_v51, %v796_v50  ;;  %v799_v54 = vpop.f32.mrb[6].mxu0 }
 0x301   :  { %v800_v55 = vpop.f32.mrb[7].mxu0 }
 0x302   :  { %v801_v56 = vadd.f32 %v800_v55, %v799_v54  ;;  %v674_v57 = vadd.f32 %v798_v53, %v763_v52 }
 0x304   :  { %v677_v58 = vadd.f32 %v801_v56, %v763_v52  ;;  %v680_v59 = vmul.f32 %v674_v57, %v674_v57 }
 0x306   :  { %682 = vadd.xlane.f32.xlu0 %v680_v59  ;;  %v681_v60 = vmul.f32 %v677_v58, %v677_v58 }
 0x30a   :  { %684 = vadd.xlane.f32.xlu0 %v681_v60 }
 0x393   :  { %v683_v61 = vpop.xlane.xlu0 %682 }
 0x394   :  { %900 = vrsqrt.f32 %v683_v61  ;;  %vm686_vm0 = vcmp.gt.f32.partialorder %v683_v61, 1e-14 }
 0x397   :  { %v685_v62 = vpop.xlane.xlu0 %684 }
 0x398   :  { %902 = vrsqrt.f32 %v685_v62  ;;  %vm687_vm1 = vcmp.gt.f32.partialorder %v685_v62, 1e-14 }
 0x39e   :  { %v901_v63 = vpop.eup %900 }
 0x39f   :  { %v690_v0 = vsel %vm686_vm0, %v901_v63, 10000000.0 }
 0x3a0   :  { %v692_v1 = vmul.f32 %v690_v0, %v674_v57 }
 0x3a2   :  { %v903_v2 = vpop.eup %902  ;;  %694 = vst [vmem:[#allocation10] sm:$0xff] %v692_v1 }
 0x3a3   :  { %v691_v3 = vsel %vm687_vm1, %v903_v2, 10000000.0 }
 0x3a4   :  { %v693_v4 = vmul.f32 %v691_v3, %v677_v58 }
 0x3a6   :  { %695 = vst [vmem:[#allocation10 + $0x8] sm:$0xff] %v693_v4 }
 0x3a7   :  { %1003 = shalt.err (!%p1000_p8)
}
 0x3a8   :  { %s1004_s15 = scalar_lea.hbm %s1174_s7, 256 }
 0x3a9   :  { %p1005_p9 = scmp.ne.s32.totalorder %s1174_s7, %s1004_s15  ;;  %p1008_p10 = scmp.lt.u32.totalorder %s1004_s15, %s1174_s7 }
 0x3ab   :  { %p1010_p11 = pnand %p1008_p10, %p1005_p9 }
 0x3ad   :  { %1013 = shalt.err (!%p1010_p11)
}
 0x3ae   :  { %707 = dma.vmem_to_hbm [thread:$0]  %s702_s6, 256, %s1174_s7, [#allocation4], %s1024_s13, %s1024_s13, %s1025_s14  }
 0x3af   :  { %1020 = dma.done.wait [#allocation4], 256  }
 0x3b0   :  { %1021 = vsyncadd [#allocation4], 4294967040 }
 0x3b1   :  { %711 = vsyncpa [#allocation3], 1 }
 0x3b2   :  { %712 = vsyncpa [#allocation6], 1 }
 0x3b3   :  { %713 = vsyncpa [#allocation9], 1 }
 0x3b4   :  { %714 = vsyncpa [#allocation4], 1 }

// kernel: tpu_custom_call.1
= control target key start
LH: loop header
LB: loop body
LE: loop exit
PB: predicated region body
PF: predicated region fallthrough
CT: control target
= control target key end

     0   :  { %12 = vsyncpa [#allocation3], 0  ;;  %s1167_s0 = inlined_call_operand.hbm [shape: f32[16,128], index: 0, kind: input, shape index: {}]   ;;  %s1168_s1 = inlined_call_operand.hbm [shape: bf16[128,256], index: 1, kind: input, shape index: {}]   ;;  %s1169_s2 = inlined_call_operand.vmem [shape: f32[1,256], index: 2, kind: input, shape index: {}]   ;;  %s1170_s3 = inlined_call_operand.hbm [shape: bf16[256,256], index: 3, kind: input, shape index: {}]   ;;  %s1171_s4 = inlined_call_operand.vmem [shape: f32[1,256], index: 4, kind: input, shape index: {}]   ;;  %s1172_s5 = inlined_call_operand.hbm [shape: bf16[256,128], index: 5, kind: input, shape index: {}]   ;;  %s1173_s6 = inlined_call_operand.vmem [shape: f32[1,128], index: 6, kind: input, shape index: {}]   ;;  %s1174_s7 = inlined_call_operand.hbm [shape: f32[16,128], index: 7, kind: output, shape index: {}]  }
   0x1   :  { %13 = vsyncpa [#allocation6], 0 }
   0x2   :  { %14 = vsyncpa [#allocation9], 0 }
   0x3   :  { %15 = vsyncpa [#allocation4], 0  ;;  %s1022_s24 = smov [#allocation5]   ;;  %s1023_s26 = smov [#allocation2]  }
   0x4   :  { %s33_s25 = sshll.u32 %s1022_s24, 4  ;;  %s21_s27 = sshll.u32 %s1023_s26, 4  ;;  %s34_s25 = int_to_ptr.vmem [resolvable:$true] %s33_s25  ;;  %s1072_s27 = int_to_ptr.vmem [resolvable:$true] %s21_s27 }
   0x5   :  { %s904_s30 = scalar_lea.hbm %s1168_s1, 2048 }
   0x6   :  { %p905_p0 = scmp.ne.s32.totalorder %s1168_s1, %s904_s30  ;;  %p908_p1 = scmp.lt.u32.totalorder %s904_s30, %s1168_s1 }
   0x8   :  { %p910_p2 = pnand %p908_p1, %p905_p0 }
   0xa   :  { %913 = shalt.err (!%p910_p2)
}
   0xb   :  { %s914_s12 = scalar_lea.vmem %s34_s25, 2048  ;;  %p919_p4 = scmp.lt.s32.totalorder %s34_s25, %s34_s25 }
   0xc   :  { %p915_p3 = scmp.ne.s32.totalorder %s34_s25, %s914_s12  ;;  %p920_p5 = scmp.lt.s32.totalorder %s914_s12, %s914_s12 }
   0xe   :  { %p921_p6 = por %p920_p5, %p919_p4 }
  0x10   :  { %p922_p7 = pnand %p921_p6, %p915_p3 }
  0x12   :  { %925 = shalt.err (!%p922_p7)
}
  0x13   :  { %s1024_s13 = smov 128   ;;  %s1025_s14 = smov 8  }
  0x14   :  { %39 = dma.hbm_to_vmem [thread:$0]  %s1168_s1, 2048, %s34_s25, [#allocation6], %s1024_s13, %s1024_s13, %s1025_s14  }
  0x15   :  { %s926_s19 = scalar_lea.hbm %s1167_s0, 256 }
  0x16   :  { %p927_p8 = scmp.ne.s32.totalorder %s1167_s0, %s926_s19  ;;  %p930_p9 = scmp.lt.u32.totalorder %s926_s19, %s1167_s0 }
  0x18   :  { %p932_p10 = pnand %p930_p9, %p927_p8 }
  0x1a   :  { %935 = shalt.err (!%p932_p10)
}
  0x1b   :  { %s936_s24 = scalar_lea.vmem %s1072_s27, 256  ;;  %p941_p12 = scmp.lt.s32.totalorder %s1072_s27, %s1072_s27 }
  0x1c   :  { %p937_p11 = scmp.ne.s32.totalorder %s1072_s27, %s936_s24  ;;  %p942_p13 = scmp.lt.s32.totalorder %s936_s24, %s936_s24 }
  0x1e   :  { %p943_p0 = por %p942_p13, %p941_p12 }
  0x20   :  { %p944_p1 = pnand %p943_p0, %p937_p11 }
  0x22   :  { %947 = shalt.err (!%p944_p1)
}
  0x23   :  { %27 = dma.hbm_to_vmem [thread:$0]  %s1167_s0, 256, %s1072_s27, [#allocation3], %s1024_s13, %s1024_s13, %s1025_s14  }
  0x24   :  { %s1026_s26 = smov [#allocation7]   ;;  %s1027_s29 = smov [#allocation8]  }
  0x25   :  { %s47_s28 = sshll.u32 %s1026_s26, 4  ;;  %s61_s30 = sshll.u32 %s1027_s29, 4  ;;  %s48_s28 = int_to_ptr.vmem [resolvable:$true] %s47_s28  ;;  %s1109_s30 = int_to_ptr.vmem [resolvable:$true] %s61_s30 }
  0x26   :  { %s948_s10 = scalar_lea.hbm %s1170_s3, 4096 }
  0x27   :  { %p949_p2 = scmp.ne.s32.totalorder %s1170_s3, %s948_s10  ;;  %p952_p3 = scmp.lt.u32.totalorder %s948_s10, %s1170_s3 }
  0x29   :  { %p954_p4 = pnand %p952_p3, %p949_p2 }
  0x2b   :  { %957 = shalt.err (!%p954_p4)
}
  0x2c   :  { %s958_s0 = scalar_lea.vmem %s48_s28, 4096  ;;  %p963_p6 = scmp.lt.s32.totalorder %s48_s28, %s48_s28 }
  0x2d   :  { %p959_p5 = scmp.ne.s32.totalorder %s48_s28, %s958_s0  ;;  %p964_p7 = scmp.lt.s32.totalorder %s958_s0, %s958_s0 }
  0x2f   :  { %p965_p8 = por %p964_p7, %p963_p6 }
  0x31   :  { %p966_p9 = pnand %p965_p8, %p959_p5 }
  0x33   :  { %969 = shalt.err (!%p966_p9)
}
  0x34   :  { %53 = dma.hbm_to_vmem [thread:$0]  %s1170_s3, 4096, %s48_s28, [#allocation6], %s1024_s13, %s1024_s13, %s1025_s14  }
  0x35   :  { %s970_s20 = scalar_lea.hbm %s1172_s5, 2048 }
  0x36   :  { %p971_p10 = scmp.ne.s32.totalorder %s1172_s5, %s970_s20  ;;  %p974_p11 = scmp.lt.u32.totalorder %s970_s20, %s1172_s5 }
  0x38   :  { %p976_p12 = pnand %p974_p11, %p971_p10 }
  0x3a   :  { %979 = shalt.err (!%p976_p12)
}
  0x3b   :  { %s980_s1 = scalar_lea.vmem %s1109_s30, 2048  ;;  %p985_p0 = scmp.lt.s32.totalorder %s1109_s30, %s1109_s30 }
  0x3c   :  { %p981_p13 = scmp.ne.s32.totalorder %s1109_s30, %s980_s1  ;;  %p986_p1 = scmp.lt.s32.totalorder %s980_s1, %s980_s1 }
  0x3e   :  { %p987_p2 = por %p986_p1, %p985_p0 }
  0x40   :  { %p988_p3 = pnand %p987_p2, %p981_p13 }
  0x42   :  { %991 = shalt.err (!%p988_p3)
}
  0x43   :  { %s1028_s3 = smov 64   ;;  %s1029_s25 = smov 4  }
  0x44   :  { %67 = dma.hbm_to_vmem [thread:$0]  %s1172_s5, 2048, %s1109_s30, [#allocation9], %s1028_s3, %s1028_s3, %s1029_s25  }
  0x45   :  { %1014 = dma.done.wait [#allocation3], 256  }
  0x46   :  { %1015 = vsyncadd [#allocation3], 4294967040 }
  0x47   :  { %1016 = dma.done.wait [#allocation6], 6144  }
  0x48   :  { %1017 = vsyncadd [#allocation6], 4294961152 }
  0x49   :  { %1018 = dma.done.wait [#allocation9], 2048  }
  0x4a   :  { %1019 = vsyncadd [#allocation9], 4294965248  ;;  %v1030_v0 = vmov 0   ;;  %v812_v1 = vld [vmem:[#allocation5 + $0x4] ss:$8 sps:$4 sm:$0xff]   ;;  %v83_v26 = vld [vmem:[#allocation2] sm:$0xff]  ;;  %v104_v62 = vlaneseq }
  0x4b   :  { %226 = vmatprep.mubr.bf16.mxu0 %v1030_v0  ;;  %v814_v2 = vld [vmem:[#allocation5] ss:$8 sps:$4 sm:$0xff]   ;;  %194 = vmatprep.subr.bf16.mxu0 %v812_v1  ;;  %v815_v3 = vld [vmem:[#allocation5 + $0x14] ss:$8 sps:$4 sm:$0xff]   ;;  %v817_v4 = vld [vmem:[#allocation5 + $0x10] ss:$8 sps:$4 sm:$0xff]  }
  0x4c   :  { %195 = vmatpush1.bf16.msra.mxu0 %v814_v2  ;;  %v818_v5 = vld [vmem:[#allocation5 + $0x24] ss:$8 sps:$4 sm:$0xff]   ;;  %v820_v6 = vld [vmem:[#allocation5 + $0x20] ss:$8 sps:$4 sm:$0xff]   ;;  %v821_v7 = vld [vmem:[#allocation5 + $0x34] ss:$8 sps:$4 sm:$0xff]  }
  0x4d   :  { %196 = vmatprep.subr.bf16.mxu0 %v815_v3  ;;  %v823_v8 = vld [vmem:[#allocation5 + $0x30] ss:$8 sps:$4 sm:$0xff]   ;;  %v824_v9 = vld [vmem:[#allocation5 + $0x44] ss:$8 sps:$4 sm:$0xff]   ;;  %v838_v11 = vld [vmem:[#allocation7] ss:$8 sps:$4 sm:$0xff]  }
  0x4e   :  { %v836_v10 = vld [vmem:[#allocation7 + $0x4] ss:$8 sps:$4 sm:$0xff]   ;;  %v839_v12 = vld [vmem:[#allocation7 + $0x14] ss:$8 sps:$4 sm:$0xff]   ;;  %v826_v13 = vld [vmem:[#allocation5 + $0x40] ss:$8 sps:$4 sm:$0xff]  }
  0x4f   :  { %451 = vmatprep.subr.bf16.mxu1 %v836_v10  ;;  %v841_v14 = vld [vmem:[#allocation7 + $0x10] ss:$8 sps:$4 sm:$0xff]   ;;  %v827_v15 = vld [vmem:[#allocation5 + $0x54] ss:$8 sps:$4 sm:$0xff]   ;;  %v842_v16 = vld [vmem:[#allocation7 + $0x24] ss:$8 sps:$4 sm:$0xff]  }
  0x50   :  { %197 = vmatpush1.bf16.msra.mxu0 %v817_v4  ;;  %452 = vmatpush1.bf16.msra.mxu1 %v838_v11  ;;  %v829_v17 = vld [vmem:[#allocation5 + $0x50] ss:$8 sps:$4 sm:$0xff]   ;;  %v844_v18 = vld [vmem:[#allocation7 + $0x20] ss:$8 sps:$4 sm:$0xff]   ;;  %v830_v19 = vld [vmem:[#allocation5 + $0x64] ss:$8 sps:$4 sm:$0xff]  }
  0x51   :  { %198 = vmatprep.subr.bf16.mxu0 %v818_v5  ;;  %453 = vmatprep.subr.bf16.mxu1 %v839_v12  ;;  %v845_v20 = vld [vmem:[#allocation7 + $0x34] ss:$8 sps:$4 sm:$0xff]   ;;  %v832_v21 = vld [vmem:[#allocation5 + $0x60] ss:$8 sps:$4 sm:$0xff]   ;;  %v847_v22 = vld [vmem:[#allocation7 + $0x30] ss:$8 sps:$4 sm:$0xff]  }
  0x52   :  { %v833_v23 = vld [vmem:[#allocation5 + $0x74] ss:$8 sps:$4 sm:$0xff]   ;;  %v848_v24 = vld [vmem:[#allocation7 + $0x44] ss:$8 sps:$4 sm:$0xff]   ;;  %v835_v25 = vld [vmem:[#allocation5 + $0x70] ss:$8 sps:$4 sm:$0xff]  }
  0x53   :  { %v84_v27 = vld [vmem:[#allocation2 + $0x8] sm:$0xff]  ;;  %v850_v28 = vld [vmem:[#allocation7 + $0x40] ss:$8 sps:$4 sm:$0xff]   ;;  %v854_v32 = vld [vmem:[#allocation7 + $0x64] ss:$8 sps:$4 sm:$0xff]   ;;  %v105_v63 = vshrl.u32 %v104_v62, 7 }
  0x54   :  { %199 = vmatpush1.bf16.msra.mxu0 %v820_v6  ;;  %454 = vmatpush1.bf16.msra.mxu1 %v841_v14  ;;  %v851_v29 = vld [vmem:[#allocation7 + $0x54] ss:$8 sps:$4 sm:$0xff]   ;;  %v853_v30 = vld [vmem:[#allocation7 + $0x50] ss:$8 sps:$4 sm:$0xff]   ;;  %v85_v31 = vpack.c.bf16 %v84_v27, %v83_v26  ;;  %v856_v33 = vld [vmem:[#allocation7 + $0x60] ss:$8 sps:$4 sm:$0xff]  }
  0x55   :  { %200 = vmatprep.subr.bf16.mxu0 %v821_v7  ;;  %455 = vmatprep.subr.bf16.mxu1 %v842_v16  ;;  %v857_v34 = vld [vmem:[#allocation7 + $0x74] ss:$8 sps:$4 sm:$0xff]   ;;  %v859_v35 = vld [vmem:[#allocation7 + $0x70] ss:$8 sps:$4 sm:$0xff]   ;;  %v860_v36 = vld [vmem:[#allocation7 + $0x84] ss:$8 sps:$4 sm:$0xff]  }
  0x56   :  { %v862_v37 = vld [vmem:[#allocation7 + $0x80] ss:$8 sps:$4 sm:$0xff]   ;;  %v863_v38 = vld [vmem:[#allocation7 + $0x94] ss:$8 sps:$4 sm:$0xff]   ;;  %v865_v39 = vld [vmem:[#allocation7 + $0x90] ss:$8 sps:$4 sm:$0xff]  }
  0x57   :  { %v866_v40 = vld [vmem:[#allocation7 + $0xa4] ss:$8 sps:$4 sm:$0xff]   ;;  %v868_v41 = vld [vmem:[#allocation7 + $0xa0] ss:$8 sps:$4 sm:$0xff]   ;;  %v869_v42 = vld [vmem:[#allocation7 + $0xb4] ss:$8 sps:$4 sm:$0xff]  }
  0x58   :  { %201 = vmatpush1.bf16.msra.mxu0 %v823_v8  ;;  %456 = vmatpush1.bf16.msra.mxu1 %v844_v18  ;;  %v871_v43 = vld [vmem:[#allocation7 + $0xb0] ss:$8 sps:$4 sm:$0xff]   ;;  %v872_v44 = vld [vmem:[#allocation7 + $0xc4] ss:$8 sps:$4 sm:$0xff]   ;;  %v874_v45 = vld [vmem:[#allocation7 + $0xc0] ss:$8 sps:$4 sm:$0xff]  }
  0x59   :  { %202 = vmatprep.subr.bf16.mxu0 %v824_v9  ;;  %457 = vmatprep.subr.bf16.mxu1 %v845_v20  ;;  %v875_v46 = vld [vmem:[#allocation7 + $0xd4] ss:$8 sps:$4 sm:$0xff]   ;;  %v877_v47 = vld [vmem:[#allocation7 + $0xd0] ss:$8 sps:$4 sm:$0xff]   ;;  %v878_v48 = vld [vmem:[#allocation7 + $0xe4] ss:$8 sps:$4 sm:$0xff]  }
  0x5a   :  { %v880_v49 = vld [vmem:[#allocation7 + $0xe0] ss:$8 sps:$4 sm:$0xff]   ;;  %v881_v50 = vld [vmem:[#allocation7 + $0xf4] ss:$8 sps:$4 sm:$0xff]   ;;  %v883_v51 = vld [vmem:[#allocation7 + $0xf0] ss:$8 sps:$4 sm:$0xff]  }
  0x5b   :  { %v884_v52 = vld [vmem:[#allocation8 + $0x40] sm:$0xff]   ;;  %v886_v54 = vld [vmem:[#allocation8 + $0x48] sm:$0xff]   ;;  %v888_v56 = vld [vmem:[#allocation8 + $0x50] sm:$0xff]   ;;  %v106_v0 = vsub.s32 0, %v105_v63  ;;  %v110_v2 = vsub.s32 1, %v105_v63  ;;  %s1031_s9 = smov [#allocation10]  }
  0x5c   :  { %203 = vmatpush1.bf16.msra.mxu0 %v826_v13  ;;  %458 = vmatpush1.bf16.msra.mxu1 %v847_v22  ;;  %v885_v53 = vld [vmem:[#allocation8] sm:$0xff]   ;;  %v887_v55 = vld [vmem:[#allocation8 + $0x8] sm:$0xff]   ;;  %v889_v57 = vld [vmem:[#allocation8 + $0x10] sm:$0xff]  }
  0x5d   :  { %204 = vmatprep.subr.bf16.mxu0 %v827_v15  ;;  %459 = vmatprep.subr.bf16.mxu1 %v848_v24  ;;  %v890_v58 = vld [vmem:[#allocation8 + $0x58] sm:$0xff]   ;;  %v892_v60 = vld [vmem:[#allocation8 + $0x60] sm:$0xff]   ;;  %v102_v1 = vld [vmem:[%s1169_s2] sm:$0x3] }
  0x5e   :  { %v891_v59 = vld [vmem:[#allocation8 + $0x18] sm:$0xff]   ;;  %v893_v61 = vld [vmem:[#allocation8 + $0x20] sm:$0xff]   ;;  %v107_v3 = vrot.slane %v102_v1, %v106_v0  ;;  %v111_v4 = vrot.slane %v102_v1, %v110_v2  ;;  %v895_v24 = vld [vmem:[#allocation8 + $0x28] sm:$0xff]  }
  0x5f   :  { %v897_v26 = vld [vmem:[#allocation8 + $0x30] sm:$0xff]   ;;  %v898_v27 = vld [vmem:[#allocation8 + $0x78] sm:$0xff]  }
  0x60   :  { %205 = vmatpush1.bf16.msra.mxu0 %v829_v17  ;;  %460 = vmatpush1.bf16.msra.mxu1 %v850_v28  ;;  %v899_v28 = vld [vmem:[#allocation8 + $0x38] sm:$0xff]  }
  0x61   :  { %206 = vmatprep.subr.bf16.mxu0 %v830_v19  ;;  %461 = vmatprep.subr.bf16.mxu1 %v851_v29  ;;  %v279_v29 = vld [vmem:[%s1171_s4] sm:$0x3] }
  0x64   :  { %207 = vmatpush1.bf16.msra.mxu0 %v832_v21  ;;  %462 = vmatpush1.bf16.msra.mxu1 %v853_v30  ;;  %v284_v30 = vrot.slane %v279_v29, %v106_v0 }
  0x65   :  { %208 = vmatprep.subr.bf16.mxu0 %v833_v23  ;;  %463 = vmatprep.subr.bf16.mxu1 %v854_v32  ;;  %v894_v23 = vld [vmem:[#allocation8 + $0x68] sm:$0xff]  }
  0x68   :  { %209 = vmatpush1.bf16.msra.mxu0 %v835_v25  ;;  %464 = vmatpush1.bf16.msra.mxu1 %v856_v33  ;;  %v896_v25 = vld [vmem:[#allocation8 + $0x70] sm:$0xff]  }
  0x69   :  { %465 = vmatprep.subr.bf16.mxu1 %v857_v34  ;;  %780 = vmatprep.subr.bf16.mxu0 %v884_v52  ;;  %v763_v52 = vld [vmem:[%s1173_s6] ss:$0 sm:$0xff]  ;;  %s701_s6 = sshll.u32 %s1031_s9, 4  ;;  %s702_s6 = int_to_ptr.vmem [resolvable:$true] %s701_s6 }
  0x6a   :  { %s992_s10 = scalar_lea.vmem %s702_s6, 256  ;;  %p997_p5 = scmp.lt.s32.totalorder %s702_s6, %s702_s6 }
  0x6b   :  { %227 = vmatmul.mubr.bf16.vlgmr.msra.gmra.mrb[0].mxu0 %v85_v31  ;;  %v288_v31 = vrot.slane %v279_v29, %v110_v2  ;;  %p993_p4 = scmp.ne.s32.totalorder %s702_s6, %s992_s10  ;;  %p998_p6 = scmp.lt.s32.totalorder %s992_s10, %s992_s10 }
  0x6c   :  { %466 = vmatpush1.bf16.msra.mxu1 %v859_v35  ;;  %781 = vmatpush3.bf16.msra.mxu0 %v885_v53 }
  0x6d   :  { %467 = vmatprep.subr.bf16.mxu1 %v860_v36  ;;  %782 = vmatprep.subr.bf16.mxu0 %v886_v54  ;;  %p999_p7 = por %p998_p6, %p997_p5 }
  0x6f   :  { %p1000_p8 = pnand %p999_p7, %p993_p4 }
  0x70   :  { %468 = vmatpush1.bf16.msra.mxu1 %v862_v37  ;;  %783 = vmatpush3.bf16.msra.mxu0 %v887_v55 }
  0x71   :  { %469 = vmatprep.subr.bf16.mxu1 %v863_v38  ;;  %784 = vmatprep.subr.bf16.mxu0 %v888_v56 }
  0x74   :  { %470 = vmatpush1.bf16.msra.mxu1 %v865_v39  ;;  %785 = vmatpush3.bf16.msra.mxu0 %v889_v57 }
  0x75   :  { %471 = vmatprep.subr.bf16.mxu1 %v866_v40  ;;  %786 = vmatprep.subr.bf16.mxu0 %v890_v58 }
  0x78   :  { %472 = vmatpush1.bf16.msra.mxu1 %v868_v41  ;;  %787 = vmatpush3.bf16.msra.mxu0 %v891_v59 }
  0x79   :  { %473 = vmatprep.subr.bf16.mxu1 %v869_v42  ;;  %788 = vmatprep.subr.bf16.mxu0 %v892_v60 }
  0x7c   :  { %474 = vmatpush1.bf16.msra.mxu1 %v871_v43  ;;  %789 = vmatpush3.bf16.msra.mxu0 %v893_v61 }
  0x7d   :  { %475 = vmatprep.subr.bf16.mxu1 %v872_v44  ;;  %790 = vmatprep.subr.bf16.mxu0 %v894_v23 }
  0x80   :  { %476 = vmatpush1.bf16.msra.mxu1 %v874_v45  ;;  %791 = vmatpush3.bf16.msra.mxu0 %v895_v24 }
  0x81   :  { %477 = vmatprep.subr.bf16.mxu1 %v875_v46  ;;  %792 = vmatprep.subr.bf16.mxu0 %v896_v25 }
  0x84   :  { %478 = vmatpush1.bf16.msra.mxu1 %v877_v47  ;;  %793 = vmatpush3.bf16.msra.mxu0 %v897_v26 }
  0x85   :  { %479 = vmatprep.subr.bf16.mxu1 %v878_v48  ;;  %794 = vmatprep.subr.bf16.mxu0 %v898_v27 }
  0x88   :  { %480 = vmatpush1.bf16.msra.mxu1 %v880_v49  ;;  %795 = vmatpush3.bf16.msra.mxu0 %v899_v28 }
  0x89   :  { %481 = vmatprep.subr.bf16.mxu1 %v881_v50 }
  0x8c   :  { %482 = vmatpush1.bf16.msra.mxu1 %v883_v51 }
 0x13e   :  { %v228_v5 = vpop.f32.mrb[0].mxu0 }
 0x13f   :  { %v229_v6 = vadd.f32 %v228_v5, %v107_v3  ;;  %v230_v7 = vpop.f32.mrb[1].mxu0 }
 0x140   :  { %v231_v8 = vadd.f32 %v230_v7, %v111_v4  ;;  %v232_v9 = vpop.f32.mrb[2].mxu0 }
 0x141   :  { %v237_v10 = vmul.f32 0.01, %v229_v6  ;;  %v233_v11 = vadd.f32 %v232_v9, %v107_v3  ;;  %v234_v12 = vpop.f32.mrb[3].mxu0 }
 0x142   :  { %v238_v13 = vmul.f32 0.01, %v231_v8  ;;  %v235_v14 = vadd.f32 %v234_v12, %v111_v4 }
 0x143   :  { %v239_v15 = vmul.f32 0.01, %v233_v11  ;;  %v241_v17 = vmax.f32 %v229_v6, %v237_v10 }
 0x144   :  { %v240_v16 = vmul.f32 0.01, %v235_v14  ;;  %v242_v19 = vmax.f32 %v231_v8, %v238_v13 }
 0x145   :  { %v243_v18 = vmax.f32 %v233_v11, %v239_v15 }
 0x146   :  { %v244_v20 = vmax.f32 %v235_v14, %v240_v16 }
 0x147   :  { %v245_v21 = vpack.c.bf16 %v243_v18, %v241_v17 }
 0x148   :  { %v246_v22 = vpack.c.bf16 %v244_v20, %v242_v19 }
 0x14a   :  { %483 = vmatprep.mubr.bf16.mxu1 %v246_v22 }
 0x14b   :  { %484 = vmatmul.mubr.bf16.vlgmr.msra.gmra.mrb[0].mxu1 %v245_v21 }
 0x21e   :  { %v485_v32 = vpop.f32.mrb[0].mxu1 }
 0x21f   :  { %v486_v33 = vadd.f32 %v485_v32, %v284_v30  ;;  %v487_v34 = vpop.f32.mrb[1].mxu1 }
 0x220   :  { %v488_v35 = vadd.f32 %v487_v34, %v288_v31  ;;  %v489_v36 = vpop.f32.mrb[2].mxu1 }
 0x221   :  { %v494_v37 = vmul.f32 0.01, %v486_v33  ;;  %v490_v38 = vadd.f32 %v489_v36, %v284_v30  ;;  %v491_v39 = vpop.f32.mrb[3].mxu1 }
 0x222   :  { %v495_v40 = vmul.f32 0.01, %v488_v35  ;;  %v492_v41 = vadd.f32 %v491_v39, %v288_v31 }
 0x223   :  { %v496_v42 = vmul.f32 0.01, %v490_v38  ;;  %v498_v44 = vmax.f32 %v486_v33, %v494_v37 }
 0x224   :  { %v497_v43 = vmul.f32 0.01, %v492_v41  ;;  %v499_v46 = vmax.f32 %v488_v35, %v495_v40 }
 0x225   :  { %v500_v45 = vmax.f32 %v490_v38, %v496_v42 }
 0x226   :  { %v501_v47 = vmax.f32 %v492_v41, %v497_v43 }
 0x227   :  { %v502_v48 = vpack.c.bf16 %v500_v45, %v498_v44 }
 0x228   :  { %v503_v49 = vpack.c.bf16 %v501_v47, %v499_v46 }
 0x22a   :  { %671 = vmatprep.mubr.bf16.mxu0 %v503_v49 }
 0x22b   :  { %672 = vmatmul.mubr.bf16.vlgmr.msra.gmra.mrb[4].mxu0 %v502_v48 }
 0x2fe   :  { %v796_v50 = vpop.f32.mrb[4].mxu0 }
 0x2ff   :  { %v797_v51 = vpop.f32.mrb[5].mxu0 }
 0x300   :  { %v798_v53 = vadd.f32 %v797_v51, %v796_v50  ;;  %v799_v54 = vpop.f32.mrb[6].mxu0 }
 0x301   :  { %v800_v55 = vpop.f32.mrb[7].mxu0 }
 0x302   :  { %v801_v56 = vadd.f32 %v800_v55, %v799_v54  ;;  %v674_v57 = vadd.f32 %v798_v53, %v763_v52 }
 0x304   :  { %v677_v58 = vadd.f32 %v801_v56, %v763_v52  ;;  %v680_v59 = vmul.f32 %v674_v57, %v674_v57 }
 0x306   :  { %682 = vadd.xlane.f32.xlu0 %v680_v59  ;;  %v681_v60 = vmul.f32 %v677_v58, %v677_v58 }
 0x30a   :  { %684 = vadd.xlane.f32.xlu0 %v681_v60 }
 0x393   :  { %v683_v61 = vpop.xlane.xlu0 %682 }
 0x394   :  { %900 = vrsqrt.f32 %v683_v61  ;;  %vm686_vm0 = vcmp.gt.f32.partialorder %v683_v61, 1e-14 }
 0x397   :  { %v685_v62 = vpop.xlane.xlu0 %684 }
 0x398   :  { %902 = vrsqrt.f32 %v685_v62  ;;  %vm687_vm1 = vcmp.gt.f32.partialorder %v685_v62, 1e-14 }
 0x39e   :  { %v901_v63 = vpop.eup %900 }
 0x39f   :  { %v690_v0 = vsel %vm686_vm0, %v901_v63, 10000000.0 }
 0x3a0   :  { %v692_v1 = vmul.f32 %v690_v0, %v674_v57 }
 0x3a2   :  { %v903_v2 = vpop.eup %902  ;;  %694 = vst [vmem:[#allocation10] sm:$0xff] %v692_v1 }
 0x3a3   :  { %v691_v3 = vsel %vm687_vm1, %v903_v2, 10000000.0 }
 0x3a4   :  { %v693_v4 = vmul.f32 %v691_v3, %v677_v58 }
 0x3a6   :  { %695 = vst [vmem:[#allocation10 + $0x8] sm:$0xff] %v693_v4 }
 0x3a7   :  { %1003 = shalt.err (!%p1000_p8)
}
 0x3a8   :  { %s1004_s15 = scalar_lea.hbm %s1174_s7, 256 }
 0x3a9   :  { %p1005_p9 = scmp.ne.s32.totalorder %s1174_s7, %s1004_s15  ;;  %p1008_p10 = scmp.lt.u32.totalorder %s1004_s15, %s1174_s7 }
 0x3ab   :  { %p1010_p11 = pnand %p1008_p10, %p1005_p9 }
 0x3ad   :  { %1013 = shalt.err (!%p1010_p11)
}
 0x3ae   :  { %707 = dma.vmem_to_hbm [thread:$0]  %s702_s6, 256, %s1174_s7, [#allocation4], %s1024_s13, %s1024_s13, %s1025_s14  }
 0x3af   :  { %1020 = dma.done.wait [#allocation4], 256  }
 0x3b0   :  { %1021 = vsyncadd [#allocation4], 4294967040 }
 0x3b1   :  { %711 = vsyncpa [#allocation3], 1 }
 0x3b2   :  { %712 = vsyncpa [#allocation6], 1 }
 0x3b3   :  { %713 = vsyncpa [#allocation9], 1 }
 0x3b4   :  { %714 = vsyncpa [#allocation4], 1 }

</bundles_post_ra>
